<compile_context>
chip_gen: v7x
topology: tpu7x:2x2x1
jax: 0.10.0
libtpu: 0.0.40
codegen_flags: <defaults>
</compile_context>

<pallas_src>
import functools

import jax
import jax.numpy as jnp
from jax.experimental import pallas as pl
from jax.experimental.pallas import tpu as pltpu


def _cdiv(a, b):
    return -(-a // b)


def _round_up(a, b):
    return _cdiv(a, b) * b


# ---------------------------------------------------------------------------
# Primary path: multi-chunk HBM->HBM DMA, all copies in flight before waiting.
# ---------------------------------------------------------------------------

def _plan_chunks(B, per_batch_bytes, target_bytes=8 << 20,
                 min_chunks=4, max_chunks=8):
    """Static (start, size) batch chunks.

    Aims for ~target_bytes per DMA (amortizes per-descriptor overhead) while
    keeping several copies outstanding (min_chunks) and a bounded semaphore
    count (max_chunks).  No divisor requirement: the last chunk is ragged.
    """
    total = max(1, B * per_batch_bytes)
    n = _cdiv(total, target_bytes)
    n = max(n, min(min_chunks, B))
    n = min(n, max_chunks, B)
    bt = _cdiv(B, n)
    chunks = []
    b0 = 0
    while b0 < B:
        bsz = min(bt, B - b0)
        chunks.append((b0, bsz))
        b0 += bsz
    return tuple(chunks)


def _trim_dma_kernel(chunks, trim, dim, x_hbm, o_hbm, sem):
    # Start every chunk's copy first so multiple DMAs are outstanding, then
    # drain.  chunks/trim/dim are static Python values (exact ragged sizes).
    copies = []
    for idx, (b0, bsz) in enumerate(chunks):
        if dim == -1:
            src = x_hbm.at[pl.ds(b0, bsz), :, pl.ds(0, trim)]
        else:
            src = x_hbm.at[pl.ds(b0, bsz), pl.ds(0, trim), :]
        cp = pltpu.make_async_copy(src, o_hbm.at[pl.ds(b0, bsz)], sem.at[idx])
        cp.start()
        copies.append(cp)
    for cp in copies:
        cp.wait()


def _trim_dma(x, trim, dim):
    B, C, L = x.shape
    itemsize = jnp.dtype(x.dtype).itemsize
    if dim == -1:
        out_shape = (B, C, trim)
        per_batch_bytes = C * trim * itemsize
    else:
        out_shape = (B, trim, L)
        per_batch_bytes = trim * L * itemsize
    chunks = _plan_chunks(B, per_batch_bytes)

    return pl.pallas_call(
        functools.partial(_trim_dma_kernel, chunks, trim, dim),
        out_shape=jax.ShapeDtypeStruct(out_shape, x.dtype),
        in_specs=[pl.BlockSpec(memory_space=pl.ANY)],
        out_specs=pl.BlockSpec(memory_space=pl.ANY),
        scratch_shapes=[pltpu.SemaphoreType.DMA((len(chunks),))],
    )(x)


# ---------------------------------------------------------------------------
# VMEM-staged path for dim == -1 with sub-burst-length rows.
# Reads only a 128-rounded contiguous window, writes a lane-dense contiguous
# output block; batches aggregated per grid step.
# ---------------------------------------------------------------------------

def _trim_last_vmem_kernel(trim, x_ref, o_ref):
    o_ref[...] = x_ref[:, :, :trim]


def _trim_last_vmem(x, trim, vmem_budget_bytes=8 << 20):
    B, C, L = x.shape
    itemsize = jnp.dtype(x.dtype).itemsize

    # Window of the row to read: next multiple of 128 (lane width) past trim,
    # clamped to the full row.  Tiny rows are read whole (fully contiguous).
    W = min(L, _round_up(trim, 128))
    if W * itemsize < 1024:
        W = L

    per_batch = C * (W + trim) * itemsize            # in-block + out-block
    bt = max(1, min(B, vmem_budget_bytes // max(1, 2 * per_batch)))
    grid = (_cdiv(B, bt),)   # ragged last block: OOB reads padded, writes dropped

    return pl.pallas_call(
        functools.partial(_trim_last_vmem_kernel, trim),
        out_shape=jax.ShapeDtypeStruct((B, C, trim), x.dtype),
        grid=grid,
        in_specs=[pl.BlockSpec((bt, C, W), lambda b: (b, 0, 0))],
        out_specs=pl.BlockSpec((bt, C, trim), lambda b: (b, 0, 0)),
        compiler_params=pltpu.CompilerParams(
            dimension_semantics=("parallel",)),
    )(x)


# ---------------------------------------------------------------------------
# Public wrapper (matches Trim.forward semantics).
# ---------------------------------------------------------------------------

def trim(x, shape, dim=-1):
    """Pallas equivalent of Trim(shape, dim)(x)."""
    if dim == -1:
        assert x.ndim == 3, "dim == -1 expects a 3-D (B, C, L) input"
        B, C, L = x.shape
        assert 0 < shape <= L, (shape, L)
        itemsize = jnp.dtype(x.dtype).itemsize
        if shape < L and shape * itemsize < 512:
            # Strided-DMA contiguous runs would fall below HBM burst size;
            # use the VMEM-staged contiguous-read / lane-dense-write path.
            return _trim_last_vmem(x, shape)
        return _trim_dma(x, shape, dim=-1)

    # dim != -1: trim axis 1.  Flatten trailing dims into one (free view) so
    # the DMA sees long contiguous runs.
    assert x.ndim >= 3, "expects at least a 3-D (B, C, ...) input"
    B, C = x.shape[0], x.shape[1]
    assert 0 < shape <= C, (shape, C)
    rest = x.shape[2:]
    L = 1
    for r in rest:
        L *= r
    x3 = x.reshape(B, C, L)
    y = _trim_dma(x3, shape, dim=1)
    return y.reshape((B, shape) + rest)


class Trim:
    """Drop-in functional analogue of the PyTorch module."""

    def __init__(self, shape, dim=-1):
        self.shape = shape
        self.dim = dim

    def __call__(self, x):
        return trim(x, self.shape, self.dim)


if __name__ == "__main__":
    key = jax.random.PRNGKey(0)
    k1, k2 = jax.random.split(key)

    trim_fn = jax.jit(trim, static_argnums=(1, 2))

    # Small (B, C, L) input consistent with how Trim is used.
    B, C, L = 2, 4, 16
    x = jax.random.normal(k1, (B, C, L), dtype=jnp.float32)

    # dim == -1 with short rows -> VMEM-staged path.
    y = jax.block_until_ready(trim_fn(x, 8, -1))
    assert y.shape == (B, C, 8), y.shape
    assert jnp.array_equal(y, x[:, :, :8]), "mismatch for dim=-1 (short rows)"

    # dim == 1 -> HBM->HBM DMA path.
    y2 = jax.block_until_ready(trim_fn(x, 2, 1))
    assert y2.shape == (B, 2, L), y2.shape
    assert jnp.array_equal(y2, x[:, :2, :]), "mismatch for dim=1"

    # dim == -1 with long rows (>= 512 B contiguous runs) -> DMA path.
    x2 = jax.random.normal(k2, (2, 4, 256), dtype=jnp.float32)
    y3 = jax.block_until_ready(trim_fn(x2, 192, -1))
    assert y3.shape == (2, 4, 192), y3.shape
    assert jnp.array_equal(y3, x2[:, :, :192]), "mismatch for dim=-1 (long rows)"

    print("KERNEL_OK")
</pallas_src>

<mosaic_0001>
module attributes {stable_mosaic.version = 11 : i64} {
  func.func @_trim_last_vmem_kernel(%arg0: i32, %arg1: memref<2x4x16xf32, #tpu.memory_space<vmem>>, %arg2: memref<2x4x8xf32, #tpu.memory_space<vmem>>) attributes {dimension_semantics = [#tpu.dimension_semantics<parallel>], iteration_bounds = array<i64: 1>, scalar_prefetch = 0 : i64, scratch_operands = 0 : i64, tpu.core_type = #tpu.core_type<tc>, window_params = [{transform_indices = @transform_0, window_bounds = array<i64: 2, 4, 16>}, {transform_indices = @transform_1, window_bounds = array<i64: 2, 4, 8>}]} {
    %c0 = arith.constant 0 : index
    %c0_0 = arith.constant 0 : index
    %c0_1 = arith.constant 0 : index
    %0 = vector.load %arg1[%c0, %c0_0, %c0_1] : memref<2x4x16xf32, #tpu.memory_space<vmem>>, vector<2x4x8xf32>
    %c0_2 = arith.constant 0 : index
    %c0_3 = arith.constant 0 : index
    %c0_4 = arith.constant 0 : index
    %1 = vector.load %arg2[%c0_2, %c0_3, %c0_4] : memref<2x4x8xf32, #tpu.memory_space<vmem>>, vector<2x4x8xf32>
    tpu.vector_store %arg2[%c0_2, %c0_3, %c0_4], %0 {strides = array<i32>} : memref<2x4x8xf32, #tpu.memory_space<vmem>>, vector<2x4x8xf32>,
    return
  }
  func.func @transform_0(%arg0: i32) -> (i32, i32, i32) {
    %c0_i32 = arith.constant 0 : i32
    %c0_i32_0 = arith.constant 0 : i32
    %c0_i32_1 = arith.constant 0 : i32
    return %arg0, %c0_i32, %c0_i32_0 : i32, i32, i32
  }
  func.func @transform_1(%arg0: i32) -> (i32, i32, i32) {
    %c0_i32 = arith.constant 0 : i32
    %c0_i32_0 = arith.constant 0 : i32
    %c0_i32_1 = arith.constant 0 : i32
    return %arg0, %c0_i32, %c0_i32_0 : i32, i32, i32
  }
}

</mosaic_0001>

<bundles_post_ra>
// kernel: trim.1
= control target key start
LH: loop header
LB: loop body
LE: loop exit
PB: predicated region body
PF: predicated region fallthrough
CT: control target
= control target key end

     0   :  { %6 = vsyncpa [#allocation3], 0  ;;  %s135_s0 = inlined_call_operand.hbm [shape: f32[2,4,16], index: 0, kind: input, shape index: {}]   ;;  %s136_s1 = inlined_call_operand.hbm [shape: f32[2,4,8], index: 1, kind: output, shape index: {}]  }
   0x1   :  { %7 = vsyncpa [#allocation4], 0  ;;  %s97_s6 = smov [#allocation2]   ;;  %s49_s10 = scalar_lea.hbm %s135_s0, 128 }
   0x2   :  { %s13_s7 = sshll.u32 %s97_s6, 4  ;;  %p50_p0 = scmp.ne.s32.totalorder %s135_s0, %s49_s10  ;;  %s14_s7 = int_to_ptr.vmem [resolvable:$true] %s13_s7 }
   0x3   :  { %p53_p1 = scmp.lt.u32.totalorder %s49_s10, %s135_s0 }
   0x5   :  { %p55_p2 = pnand %p53_p1, %p50_p0 }
   0x7   :  { %58 = shalt.err (!%p55_p2)
}
   0x8   :  { %s59_s15 = scalar_lea.vmem %s14_s7, 128  ;;  %p64_p4 = scmp.lt.s32.totalorder %s14_s7, %s14_s7 }
   0x9   :  { %p60_p3 = scmp.ne.s32.totalorder %s14_s7, %s59_s15  ;;  %p65_p5 = scmp.lt.s32.totalorder %s59_s15, %s59_s15 }
   0xb   :  { %p66_p6 = por %p65_p5, %p64_p4 }
   0xd   :  { %p67_p7 = pnand %p66_p6, %p60_p3 }
   0xf   :  { %70 = shalt.err (!%p67_p7)
}
  0x10   :  { %s98_s16 = smov 64   ;;  %s99_s17 = smov 4  }
  0x11   :  { %19 = dma.hbm_to_vmem [thread:$0]  %s135_s0, 128, %s14_s7, [#allocation3], %s98_s16, %s98_s16, %s99_s17  }
  0x12   :  { %93 = dma.done.wait [#allocation3], 128  }
  0x13   :  { %94 = vsyncadd [#allocation3], 4294967168  ;;  %s100_s20 = smov [#allocation5]   ;;  %vm25_vm0 = vcmask 60416   ;;  %v23_v0 = vld [vmem:[#allocation2] sm:$0xf] }
  0x14   :  { %s33_s21 = sshll.u32 %s100_s20, 4  ;;  %v24_v1 = vld [vmem:[#allocation2 + $0x4] sm:$0xf]  ;;  %26 = vst.msk [vmem:[#allocation5] sm:$0xf] %vm25_vm0, %v23_v0  ;;  %s34_s21 = int_to_ptr.vmem [resolvable:$true] %s33_s21 }
  0x15   :  { %27 = vst.msk [vmem:[#allocation5 + $0x4] sm:$0xf] %vm25_vm0, %v24_v1  ;;  %s71_s22 = scalar_lea.vmem %s34_s21, 128  ;;  %p76_p9 = scmp.lt.s32.totalorder %s34_s21, %s34_s21 }
  0x16   :  { %p72_p8 = scmp.ne.s32.totalorder %s34_s21, %s71_s22  ;;  %p77_p10 = scmp.lt.s32.totalorder %s71_s22, %s71_s22 }
  0x18   :  { %p78_p11 = por %p77_p10, %p76_p9 }
  0x1a   :  { %p79_p12 = pnand %p78_p11, %p72_p8 }
  0x1c   :  { %82 = shalt.err (!%p79_p12)
}
  0x1d   :  { %s83_s0 = scalar_lea.hbm %s136_s1, 128 }
  0x1e   :  { %p84_p13 = scmp.ne.s32.totalorder %s136_s1, %s83_s0  ;;  %p87_p0 = scmp.lt.u32.totalorder %s83_s0, %s136_s1 }
  0x20   :  { %p89_p1 = pnand %p87_p0, %p84_p13 }
  0x22   :  { %92 = shalt.err (!%p89_p1)
}
  0x23   :  { %39 = dma.vmem_to_hbm [thread:$0]  %s34_s21, 128, %s136_s1, [#allocation4], %s98_s16, %s98_s16, %s99_s17  }
  0x24   :  { %95 = dma.done.wait [#allocation4], 128  }
  0x25   :  { %96 = vsyncadd [#allocation4], 4294967168 }
  0x26   :  { %43 = vsyncpa [#allocation3], 1 }
  0x27   :  { %44 = vsyncpa [#allocation4], 1 }

</bundles_post_ra>
